<compile_context>
chip_gen: v6e
topology: v6e:2x2x1
jax: 0.10.0
libtpu: 0.0.40
codegen_flags: <defaults>
</compile_context>

<pallas_src>
import functools

import jax
import jax.numpy as jnp
from jax import lax
from jax.experimental import pallas as pl
from jax.experimental.pallas import tpu as pltpu


def _round_up(x, m):
    return (x + m - 1) // m * m


# ----------------------- per-generation defaults ----------------------------

def _tpu_defaults():
    """Tile-size / VMEM-limit defaults keyed off VMEM capacity (v7x: 64 MiB)."""
    vmem_cap = 64 * 1024 * 1024            # conservative fallback (v7x-class)
    try:
        vmem_cap = int(pltpu.get_tpu_info().vmem_capacity_bytes)
    except Exception:
        pass
    if vmem_cap > 64 * 1024 * 1024:        # v5e / v6e: 128 MiB VMEM
        return dict(block_m=1024, block_k=512, vmem_limit=96 * 1024 * 1024)
    return dict(block_m=512, block_k=512, vmem_limit=48 * 1024 * 1024)


def _choose_tm(m_rows, block_m):
    """Pick M tile: prefer >=2 tiles (v7x megacore), minimal padding waste,
    then the largest tile."""
    m8 = _round_up(max(m_rows, 8), 8)
    if m8 <= 64:
        return m8, m8
    best_key, best = None, None
    for tm in (64, 128, 256, 512, 1024):
        if tm > max(block_m, 64):
            continue
        mp = _round_up(m_rows, tm)
        key = (0 if mp // tm >= 2 else 1, mp - m_rows, -tm)
        if best_key is None or key < best_key:
            best_key, best = key, (tm, mp)
    return best


# ----------------------------- Pallas kernel --------------------------------

def _conv_bn_kernel(*refs, relu, fuse_mode, p_survival, single_k):
    """Tiled matmul + folded-BN bias (+ReLU) (+ fused stochastic-depth combine).

    refs:
      fuse_mode None  : patches, weights, bias, out
      fuse_mode "add" : patches, weights, bias, shortcut, out
      fuse_mode "proj": patches, weights, bias, xs, w_sc, b_sc, out
    Grid: (M tiles [parallel], Cout tiles [parallel][, K tiles [arbitrary]]).
    The f32 output block is the accumulator (resident across K).
    """
    if fuse_mode == "proj":
        x_ref, w_ref, b_ref, xs_ref, wsc_ref, bsc_ref, o_ref = refs
    elif fuse_mode == "add":
        x_ref, w_ref, b_ref, sc_ref, o_ref = refs
    else:
        x_ref, w_ref, b_ref, o_ref = refs

    def epilogue(acc):
        y = acc + b_ref[...]                     # BN scale folded into weights
        if relu:
            y = jnp.maximum(y, 0.0)
        if fuse_mode == "add":                   # identity shortcut
            y = y * p_survival + sc_ref[...].astype(jnp.float32)
        elif fuse_mode == "proj":                # 1x1-conv+BN shortcut, on MXU
            sc = jnp.dot(xs_ref[...], wsc_ref[...],
                         preferred_element_type=jnp.float32) + bsc_ref[...]
            y = y * p_survival + sc
        return y.astype(o_ref.dtype)

    if single_k:                                 # whole contraction in one block
        o_ref[...] = epilogue(
            jnp.dot(x_ref[...], w_ref[...], preferred_element_type=jnp.float32))
        return

    k = pl.program_id(2)

    @pl.when(k == 0)
    def _init():
        o_ref[...] = jnp.zeros_like(o_ref)

    o_ref[...] += jnp.dot(x_ref[...], w_ref[...],
                          preferred_element_type=jnp.float32)

    @pl.when(k == pl.num_programs(2) - 1)
    def _finalize():
        o_ref[...] = epilogue(o_ref[...])


# ------------------------------- glue (JAX) ---------------------------------

def _im2col(x_nhwc, ksize, stride, padding):
    """(N,H,W,C) -> (N*Ho*Wo, ksize*ksize*C), patch order (kh, kw, c)."""
    n, h, w, c = x_nhwc.shape
    xp = jnp.pad(x_nhwc, ((0, 0), (padding, padding), (padding, padding), (0, 0)))
    ho = (h + 2 * padding - ksize) // stride + 1
    wo = (w + 2 * padding - ksize) // stride + 1
    cols = []
    for kh in range(ksize):
        for kw in range(ksize):
            patch = lax.slice(
                xp,
                (0, kh, kw, 0),
                (n, kh + (ho - 1) * stride + 1, kw + (wo - 1) * stride + 1, c),
                (1, stride, stride, 1),
            )
            cols.append(patch)
    patches = jnp.concatenate(cols, axis=-1)     # (N, Ho, Wo, k*k*C)
    return patches.reshape(n * ho * wo, ksize * ksize * c), (n, ho, wo)


def conv_bn(x_nhwc, w_hwio, conv_bias, bn, *, stride, padding, relu,
            combine=None, p=None, matmul_dtype=jnp.bfloat16, eps=1e-5,
            block_m=None, block_k=None):
    """Conv2d(+bias) + eval-BatchNorm (+ReLU), optionally fused with the
    stochastic-depth combine  out = y*p + shortcut.

    combine:
      None                                   plain conv+bn(+relu)
      ("add",  sc_nhwc)                      identity shortcut, added in epilogue
      ("proj", xs_nhwc, w_sc, b_sc, bn_sc)   1x1-conv+BN shortcut computed on the
                                             MXU inside the epilogue
    """
    defaults = _tpu_defaults()
    block_m = block_m or defaults["block_m"]
    block_k = block_k or defaults["block_k"]
    vmem_limit = defaults["vmem_limit"]

    gamma, beta, mean, var = bn
    kh, kw, cin, cout = w_hwio.shape
    patches, (n, ho, wo) = _im2col(x_nhwc, kh, stride, padding)
    m_rows, kdim = patches.shape

    # Fold conv bias + eval BN into the weight matrix and a per-channel bias.
    scale = gamma * lax.rsqrt(var + eps)                # (cout,)
    bias = beta + (conv_bias - mean) * scale            # (cout,)
    wmat = w_hwio.reshape(kdim, cout) * scale[None, :]  # scale folded -> MXU only

    # Lane / MXU friendly padding & tiling.
    cp = _round_up(cout, 128)
    tn = 256 if cp % 256 == 0 else 128
    tm, mp = _choose_tm(m_rows, block_m)
    tk = min(block_k, _round_up(kdim, 128))
    kp = _round_up(kdim, tk)
    nm, nn, nk = mp // tm, cp // tn, kp // tk
    single_k = (nk == 1)

    itemsize = jnp.dtype(matmul_dtype).itemsize
    patches = jnp.pad(patches, ((0, mp - m_rows), (0, kp - kdim))).astype(matmul_dtype)
    wmat = jnp.pad(wmat, ((0, kp - kdim), (0, cp - cout))).astype(matmul_dtype)
    bias_p = jnp.pad(bias, (0, cp - cout)).reshape(1, cp).astype(jnp.float32)

    fuse_mode = None if combine is None else combine[0]
    p_survival = float(p) if fuse_mode is not None else 1.0

    args = [patches, wmat, bias_p]
    extra_bytes = 0
    proj_flops = 0
    cin_sp = 0

    if fuse_mode == "add":
        sc = combine[1].reshape(m_rows, cout).astype(matmul_dtype)
        sc = jnp.pad(sc, ((0, mp - m_rows), (0, cp - cout)))
        args.append(sc)
        extra_bytes += mp * cp * itemsize
    elif fuse_mode == "proj":
        xs_nhwc, w_sc, b_sc, bn_sc = combine[1], combine[2], combine[3], combine[4]
        g2, bt2, mu2, v2 = bn_sc
        s2 = g2 * lax.rsqrt(v2 + eps)
        bias_sc = bt2 + (b_sc - mu2) * s2
        cin_s = xs_nhwc.shape[-1]
        cin_sp = _round_up(cin_s, 128)
        xs = xs_nhwc.reshape(m_rows, cin_s).astype(matmul_dtype)
        xs = jnp.pad(xs, ((0, mp - m_rows), (0, cin_sp - cin_s)))
        wsc = w_sc.reshape(cin_s, cout) * s2[None, :]
        wsc = jnp.pad(wsc, ((0, cin_sp - cin_s), (0, cp - cout))).astype(matmul_dtype)
        bsc = jnp.pad(bias_sc, (0, cp - cout)).reshape(1, cp).astype(jnp.float32)
        args += [xs, wsc, bsc]
        extra_bytes += mp * cin_sp * itemsize + nm * cin_sp * cp * itemsize + cp * 4
        proj_flops = 2 * mp * cin_sp * cp

    # Index maps (arity depends on whether the reduction axis exists).
    if single_k:
        grid = (nm, nn)
        x_map = lambda i, j: (i, 0)
        w_map = lambda i, j: (0, j)
        col_map = lambda i, j: (0, j)        # bias / b_sc / w_sc (K-invariant)
        row_map = lambda i, j: (i, 0)        # xs
        mn_map = lambda i, j: (i, j)         # shortcut / output
        sems = ("parallel", "parallel")
    else:
        grid = (nm, nn, nk)
        x_map = lambda i, j, k: (i, k)
        w_map = lambda i, j, k: (k, j)
        col_map = lambda i, j, k: (0, j)
        row_map = lambda i, j, k: (i, 0)
        mn_map = lambda i, j, k: (i, j)
        sems = ("parallel", "parallel", "arbitrary")

    in_specs = [
        pl.BlockSpec((tm, tk), x_map),       # patches: streamed over M (and K)
        pl.BlockSpec((tk, tn), w_map),       # weights
        pl.BlockSpec((1, tn), col_map),      # folded-BN bias (tiny, K-invariant)
    ]
    if fuse_mode == "add":
        in_specs.append(pl.BlockSpec((tm, tn), mn_map))
    elif fuse_mode == "proj":
        in_specs += [
            pl.BlockSpec((tm, cin_sp), row_map),
            pl.BlockSpec((cin_sp, tn), col_map),
            pl.BlockSpec((1, tn), col_map),
        ]

    kernel = functools.partial(_conv_bn_kernel, relu=relu, fuse_mode=fuse_mode,
                               p_survival=p_survival, single_k=single_k)

    # Weights are re-fetched per M tile only when their block index actually
    # changes between consecutive grid steps (nn > 1 or nk > 1).
    w_fetches = nm if (nn > 1 or nk > 1) else 1
    bytes_accessed = (mp * kp * itemsize                 # patches, streamed once
                      + w_fetches * kp * cp * itemsize   # weights
                      + nm * nn * cp * 4                 # bias
                      + extra_bytes
                      + mp * cp * 4)                     # f32 output write

    out = pl.pallas_call(
        kernel,
        out_shape=jax.ShapeDtypeStruct((mp, cp), jnp.float32),
        grid_spec=pltpu.PrefetchScalarGridSpec(
            num_scalar_prefetch=0,
            grid=grid,
            in_specs=in_specs,
            out_specs=pl.BlockSpec((tm, tn), mn_map),
        ),
        compiler_params=pltpu.CompilerParams(
            dimension_semantics=sems,
            vmem_limit_bytes=vmem_limit,
        ),
        cost_estimate=pl.CostEstimate(
            flops=int(2 * mp * kp * cp + proj_flops),
            transcendentals=0,
            bytes_accessed=int(bytes_accessed),
        ),
    )(*args)

    return out[:m_rows, :cout].reshape(n, ho, wo, cout)


# --------------------------- the module in JAX -------------------------------

class StochasticDepthBasicBlockPallas:
    expansion = 1

    def __init__(self, key, p, in_channels, out_channels, stride=1):
        self.p = float(p)
        self.stride = stride
        self.in_channels = in_channels
        self.out_channels = out_channels
        oc = out_channels * self.expansion
        self.has_shortcut = (stride != 1) or (in_channels != oc)

        ks = jax.random.split(key, 12)

        def conv_params(kw_key, kb_key, khs, cin, cout):
            fan_in = cin * khs * khs
            w = jax.random.normal(kw_key, (khs, khs, cin, cout), jnp.float32) / jnp.sqrt(fan_in)
            b = 0.1 * jax.random.normal(kb_key, (cout,), jnp.float32)
            return w, b

        def bn_params(kg, kb, km, kv, c):
            gamma = 0.5 + jax.random.uniform(kg, (c,), jnp.float32)
            beta = 0.1 * jax.random.normal(kb, (c,), jnp.float32)
            mean = 0.1 * jax.random.normal(km, (c,), jnp.float32)
            var = 0.5 + jax.random.uniform(kv, (c,), jnp.float32)
            return gamma, beta, mean, var

        # residual branch
        self.w1, self.b1 = conv_params(ks[0], ks[1], 3, in_channels, out_channels)
        self.bn1 = bn_params(ks[2], ks[3], ks[4], ks[5], out_channels)
        self.w2, self.b2 = conv_params(ks[6], ks[7], 3, out_channels, oc)
        self.bn2 = bn_params(ks[8], ks[9], ks[10], ks[11], oc)

        # shortcut branch
        if self.has_shortcut:
            ks2 = jax.random.split(ks[11], 6)
            self.ws, self.bs = conv_params(ks2[0], ks2[1], 1, in_channels, oc)
            self.bns = bn_params(ks2[2], ks2[3], ks2[4], ks2[5], oc)

    def __call__(self, x_nchw, matmul_dtype=jnp.bfloat16):
        # eval-mode forward: residual(x) * p + shortcut(x)
        x = jnp.transpose(x_nchw, (0, 2, 3, 1)).astype(jnp.float32)  # NCHW -> NHWC

        # conv1 + BN1 + ReLU
        r = conv_bn(x, self.w1, self.b1, self.bn1,
                    stride=self.stride, padding=1, relu=True,
                    matmul_dtype=matmul_dtype)

        # conv2 + BN2 with the stochastic-depth combine and the shortcut branch
        # fused into the same kernel (no separate shortcut pallas_call).
        if self.has_shortcut:
            xs = x[:, ::self.stride, ::self.stride, :]   # strided 1x1-conv input
            combine = ("proj", xs, self.ws, self.bs, self.bns)
        else:
            combine = ("add", x)
        out = conv_bn(r, self.w2, self.b2, self.bn2,
                      stride=1, padding=1, relu=False,
                      combine=combine, p=self.p,
                      matmul_dtype=matmul_dtype)

        return jnp.transpose(out, (0, 3, 1, 2))  # NHWC -> NCHW


# ------------------------------ pure-JAX ref ---------------------------------

def _ref_conv_bn(x, w, b, gamma, beta, mean, var, stride, padding, relu, eps=1e-5):
    y = lax.conv_general_dilated(
        x, w, window_strides=(stride, stride),
        padding=[(padding, padding), (padding, padding)],
        dimension_numbers=("NHWC", "HWIO", "NHWC"))
    y = y + b
    y = gamma * (y - mean) / jnp.sqrt(var + eps) + beta
    return jnp.maximum(y, 0.0) if relu else y


def _ref_forward(block, x_nchw):
    x = jnp.transpose(x_nchw, (0, 2, 3, 1)).astype(jnp.float32)
    r = _ref_conv_bn(x, block.w1, block.b1, *block.bn1, block.stride, 1, True)
    r = _ref_conv_bn(r, block.w2, block.b2, *block.bn2, 1, 1, False)
    if block.has_shortcut:
        s = _ref_conv_bn(x, block.ws, block.bs, *block.bns, block.stride, 0, False)
    else:
        s = x
    out = r * block.p + s
    return jnp.transpose(out, (0, 3, 1, 2))


# ----------------------------------- main ------------------------------------

if __name__ == "__main__":
    key = jax.random.PRNGKey(0)
    k_x, k_params = jax.random.split(key)

    # Small NCHW input consistent with the PyTorch module.
    x = jax.random.normal(k_x, (2, 4, 16, 16), jnp.float32)

    block = StochasticDepthBasicBlockPallas(
        k_params, p=0.5, in_channels=4, out_channels=8, stride=2)

    ref = _ref_forward(block, x)

    # f32 MXU operands: strict check.
    fwd_f32 = jax.jit(functools.partial(block.__call__, matmul_dtype=jnp.float32))
    out_f32 = jax.block_until_ready(fwd_f32(x))
    assert out_f32.shape == (2, 8, 8, 8), out_f32.shape
    assert jnp.allclose(out_f32, ref, rtol=1e-4, atol=1e-4), "f32 mismatch vs reference"

    # Default path: bf16 MXU operands (f32 accumulation + f32 epilogue).
    fwd = jax.jit(block.__call__)
    out_bf16 = jax.block_until_ready(fwd(x))
    assert jnp.allclose(out_bf16, ref, rtol=1e-1, atol=1e-1), "bf16 mismatch vs reference"

    print("KERNEL_OK")
</pallas_src>

<mosaic_0001>
module attributes {stable_mosaic.version = 11 : i64} {
  func.func @_conv_bn_kernel(%arg0: i32, %arg1: i32, %arg2: memref<64x128xf32, #tpu.memory_space<vmem>>, %arg3: memref<128x128xf32, #tpu.memory_space<vmem>>, %arg4: memref<1x128xf32, #tpu.memory_space<vmem>>, %arg5: memref<64x128xf32, #tpu.memory_space<vmem>>) attributes {dimension_semantics = [#tpu.dimension_semantics<parallel>, #tpu.dimension_semantics<parallel>], iteration_bounds = array<i64: 2, 1>, scalar_prefetch = 0 : i64, scratch_operands = 0 : i64, tpu.core_type = #tpu.core_type<tc>, window_params = [{transform_indices = @transform_0, window_bounds = array<i64: 64, 128>}, {transform_indices = @transform_1, window_bounds = array<i64: 128, 128>}, {transform_indices = @transform_2, window_bounds = array<i64: 1, 128>}, {transform_indices = @transform_3, window_bounds = array<i64: 64, 128>}]} {
    %c0 = arith.constant 0 : index
    %c0_0 = arith.constant 0 : index
    %0 = vector.load %arg2[%c0, %c0_0] : memref<64x128xf32, #tpu.memory_space<vmem>>, vector<64x128xf32>
    %c0_1 = arith.constant 0 : index
    %c0_2 = arith.constant 0 : index
    %1 = vector.load %arg3[%c0_1, %c0_2] : memref<128x128xf32, #tpu.memory_space<vmem>>, vector<128x128xf32>
    %cst = arith.constant dense<0.000000e+00> : vector<64x128xf32>
    %2 = tpu.matmul %0, %1, %cst {dimension_numbers = #tpu.dot_dimension_numbers<[1], [0], [0], [1], [0, 0, 1, 1], [], []>} : vector<64x128xf32>, vector<128x128xf32>, vector<64x128xf32> -> vector<64x128xf32>
    %c0_3 = arith.constant 0 : index
    %c0_4 = arith.constant 0 : index
    %3 = vector.load %arg4[%c0_3, %c0_4] : memref<1x128xf32, #tpu.memory_space<vmem>>, vector<1x128xf32>
    %4 = vector.broadcast %3 : vector<1x128xf32> to vector<64x128xf32>
    %5 = arith.addf %2, %4 : vector<64x128xf32>
    %cst_5 = arith.constant 0.000000e+00 : f32
    %6 = vector.broadcast %cst_5 : f32 to vector<64x128xf32>
    %7 = arith.maximumf %5, %6 : vector<64x128xf32>
    %c0_6 = arith.constant 0 : index
    %c0_7 = arith.constant 0 : index
    %8 = vector.load %arg5[%c0_6, %c0_7] : memref<64x128xf32, #tpu.memory_space<vmem>>, vector<64x128xf32>
    tpu.vector_store %arg5[%c0_6, %c0_7], %7 {strides = array<i32>} : memref<64x128xf32, #tpu.memory_space<vmem>>, vector<64x128xf32>,
    return
  }
  func.func @transform_0(%arg0: i32, %arg1: i32) -> (i32, i32) {
    %c0_i32 = arith.constant 0 : i32
    %c0_i32_0 = arith.constant 0 : i32
    return %arg0, %c0_i32 : i32, i32
  }
  func.func @transform_1(%arg0: i32, %arg1: i32) -> (i32, i32) {
    %c0_i32 = arith.constant 0 : i32
    %c0_i32_0 = arith.constant 0 : i32
    return %c0_i32, %arg1 : i32, i32
  }
  func.func @transform_2(%arg0: i32, %arg1: i32) -> (i32, i32) {
    %c0_i32 = arith.constant 0 : i32
    %c0_i32_0 = arith.constant 0 : i32
    return %c0_i32, %arg1 : i32, i32
  }
  func.func @transform_3(%arg0: i32, %arg1: i32) -> (i32, i32) {
    %c0_i32 = arith.constant 0 : i32
    return %arg0, %arg1 : i32, i32
  }
}

module attributes {stable_mosaic.version = 11 : i64} {
  func.func @_conv_bn_kernel(%arg0: i32, %arg1: i32, %arg2: memref<64x128xf32, #tpu.memory_space<vmem>>, %arg3: memref<128x128xf32, #tpu.memory_space<vmem>>, %arg4: memref<1x128xf32, #tpu.memory_space<vmem>>, %arg5: memref<64x128xf32, #tpu.memory_space<vmem>>, %arg6: memref<128x128xf32, #tpu.memory_space<vmem>>, %arg7: memref<1x128xf32, #tpu.memory_space<vmem>>, %arg8: memref<64x128xf32, #tpu.memory_space<vmem>>) attributes {dimension_semantics = [#tpu.dimension_semantics<parallel>, #tpu.dimension_semantics<parallel>], iteration_bounds = array<i64: 2, 1>, scalar_prefetch = 0 : i64, scratch_operands = 0 : i64, tpu.core_type = #tpu.core_type<tc>, window_params = [{transform_indices = @transform_0, window_bounds = array<i64: 64, 128>}, {transform_indices = @transform_1, window_bounds = array<i64: 128, 128>}, {transform_indices = @transform_2, window_bounds = array<i64: 1, 128>}, {transform_indices = @transform_3, window_bounds = array<i64: 64, 128>}, {transform_indices = @transform_4, window_bounds = array<i64: 128, 128>}, {transform_indices = @transform_5, window_bounds = array<i64: 1, 128>}, {transform_indices = @transform_6, window_bounds = array<i64: 64, 128>}]} {
    %c0 = arith.constant 0 : index
    %c0_0 = arith.constant 0 : index
    %0 = vector.load %arg2[%c0, %c0_0] : memref<64x128xf32, #tpu.memory_space<vmem>>, vector<64x128xf32>
    %c0_1 = arith.constant 0 : index
    %c0_2 = arith.constant 0 : index
    %1 = vector.load %arg3[%c0_1, %c0_2] : memref<128x128xf32, #tpu.memory_space<vmem>>, vector<128x128xf32>
    %cst = arith.constant dense<0.000000e+00> : vector<64x128xf32>
    %2 = tpu.matmul %0, %1, %cst {dimension_numbers = #tpu.dot_dimension_numbers<[1], [0], [0], [1], [0, 0, 1, 1], [], []>} : vector<64x128xf32>, vector<128x128xf32>, vector<64x128xf32> -> vector<64x128xf32>
    %c0_3 = arith.constant 0 : index
    %c0_4 = arith.constant 0 : index
    %3 = vector.load %arg4[%c0_3, %c0_4] : memref<1x128xf32, #tpu.memory_space<vmem>>, vector<1x128xf32>
    %4 = vector.broadcast %3 : vector<1x128xf32> to vector<64x128xf32>
    %5 = arith.addf %2, %4 : vector<64x128xf32>
    %c0_5 = arith.constant 0 : index
    %c0_6 = arith.constant 0 : index
    %6 = vector.load %arg5[%c0_5, %c0_6] : memref<64x128xf32, #tpu.memory_space<vmem>>, vector<64x128xf32>
    %c0_7 = arith.constant 0 : index
    %c0_8 = arith.constant 0 : index
    %7 = vector.load %arg6[%c0_7, %c0_8] : memref<128x128xf32, #tpu.memory_space<vmem>>, vector<128x128xf32>
    %cst_9 = arith.constant dense<0.000000e+00> : vector<64x128xf32>
    %8 = tpu.matmul %6, %7, %cst_9 {dimension_numbers = #tpu.dot_dimension_numbers<[1], [0], [0], [1], [0, 0, 1, 1], [], []>} : vector<64x128xf32>, vector<128x128xf32>, vector<64x128xf32> -> vector<64x128xf32>
    %c0_10 = arith.constant 0 : index
    %c0_11 = arith.constant 0 : index
    %9 = vector.load %arg7[%c0_10, %c0_11] : memref<1x128xf32, #tpu.memory_space<vmem>>, vector<1x128xf32>
    %10 = vector.broadcast %9 : vector<1x128xf32> to vector<64x128xf32>
    %11 = arith.addf %8, %10 : vector<64x128xf32>
    %cst_12 = arith.constant 5.000000e-01 : f32
    %12 = vector.broadcast %cst_12 : f32 to vector<64x128xf32>
    %13 = arith.mulf %5, %12 : vector<64x128xf32>
    %14 = arith.addf %13, %11 : vector<64x128xf32>
    %c0_13 = arith.constant 0 : index
    %c0_14 = arith.constant 0 : index
    %15 = vector.load %arg8[%c0_13, %c0_14] : memref<64x128xf32, #tpu.memory_space<vmem>>, vector<64x128xf32>
    tpu.vector_store %arg8[%c0_13, %c0_14], %14 {strides = array<i32>} : memref<64x128xf32, #tpu.memory_space<vmem>>, vector<64x128xf32>,
    return
  }
  func.func @transform_0(%arg0: i32, %arg1: i32) -> (i32, i32) {
    %c0_i32 = arith.constant 0 : i32
    %c0_i32_0 = arith.constant 0 : i32
    return %arg0, %c0_i32 : i32, i32
  }
  func.func @transform_1(%arg0: i32, %arg1: i32) -> (i32, i32) {
    %c0_i32 = arith.constant 0 : i32
    %c0_i32_0 = arith.constant 0 : i32
    return %c0_i32, %arg1 : i32, i32
  }
  func.func @transform_2(%arg0: i32, %arg1: i32) -> (i32, i32) {
    %c0_i32 = arith.constant 0 : i32
    %c0_i32_0 = arith.constant 0 : i32
    return %c0_i32, %arg1 : i32, i32
  }
  func.func @transform_3(%arg0: i32, %arg1: i32) -> (i32, i32) {
    %c0_i32 = arith.constant 0 : i32
    %c0_i32_0 = arith.constant 0 : i32
    return %arg0, %c0_i32 : i32, i32
  }
  func.func @transform_4(%arg0: i32, %arg1: i32) -> (i32, i32) {
    %c0_i32 = arith.constant 0 : i32
    %c0_i32_0 = arith.constant 0 : i32
    return %c0_i32, %arg1 : i32, i32
  }
  func.func @transform_5(%arg0: i32, %arg1: i32) -> (i32, i32) {
    %c0_i32 = arith.constant 0 : i32
    %c0_i32_0 = arith.constant 0 : i32
    return %c0_i32, %arg1 : i32, i32
  }
  func.func @transform_6(%arg0: i32, %arg1: i32) -> (i32, i32) {
    %c0_i32 = arith.constant 0 : i32
    return %arg0, %arg1 : i32, i32
  }
}

</mosaic_0001>

<bundles_post_ra>
// kernel: a_call__.2
= control target key start
LH: loop header
LB: loop body
LE: loop exit
PB: predicated region body
PF: predicated region fallthrough
CT: control target
= control target key end

     0   :  { %s661_s12 = smov 0   ;;  %s663_s13 = smov 0   ;;  %s755_s0 = inlined_call_operand.vmem [shape: f32[128,128], index: 0, kind: input, shape index: {}]   ;;  %s756_s1 = inlined_call_operand.vmem [shape: f32[128,128], index: 1, kind: input, shape index: {}]   ;;  %s757_s2 = inlined_call_operand.vmem [shape: f32[1,128], index: 2, kind: input, shape index: {}]   ;;  %s758_s3 = inlined_call_operand.vmem [shape: f32[128,128], index: 3, kind: output, shape index: {}]  }
   0x1   :  { %s665_s14 = smov 0  }
   0x2 LB: > { %s25_s15 = sadd.s32 1, %s635_s13  ;;  %p485_p0 = scmp.ge.s32.totalorder %s639_s14, 1  ;;  %s639_s14 = sphi %s665_s14, %s13_s14   ;;  %s635_s13 = sphi %s663_s13, %s760_s13   ;;  %s631_s12 = sphi %s661_s12, %s759_s12  }
   0x3   : > { %p27_p1 = scmp.ge.s32.totalorder %s25_s15, 2  ;;  %p169_p2 = scmp.lt.s32.totalorder %s639_s14, 3 }
   0x5   : > { %s762_s15 = smov (%p27_p1, %s25_s15), 0  ;;  %p170_p3 = pnand %p485_p0, %p169_p2 }
   0x6   : > { %s486_s5 = sshll.u32 (!%p170_p3), %s631_s12, 3 }
   0x7   : > { %173 = sbr.rel (%p170_p3) target bundleno = 250 (0xfa), region = 32  ;;  %p204_p4 = scmp.lt.s32.totalorder (!%p170_p3), %s486_s5, 15 }
   0xc   : > { %v248_v0 = vld [vmem:[%s756_s1 + $0x78] sm:$0xff]  ;;  %v247_v1 = vld [vmem:[%s756_s1 + $0x70] sm:$0xff]  ;;  %v246_v2 = vld [vmem:[%s756_s1 + $0x68] sm:$0xff]  ;;  %s764_s5 = smov (!%p204_p4, %s486_s5), 15 }
   0xd   : > { %517 = vmatprep.subr.mxu0 %v248_v0  ;;  %561 = vmatprep.subr.mxu1 %v248_v0  ;;  %v245_v3 = vld [vmem:[%s756_s1 + $0x60] sm:$0xff]  ;;  %v244_v4 = vld [vmem:[%s756_s1 + $0x58] sm:$0xff]  ;;  %v243_v5 = vld [vmem:[%s756_s1 + $0x50] sm:$0xff]  ;;  %s487_s21 = sshll.u32 %s764_s5, 3 }
   0xe   : > { %518 = vmatpush3.msra.mxu0 %v248_v0  ;;  %577 = vmatpush3.msra.mxu1 %v248_v0  ;;  %v242_v6 = vld [vmem:[%s756_s1 + $0x48] sm:$0xff]  ;;  %v241_v7 = vld [vmem:[%s756_s1 + $0x40] sm:$0xff]  ;;  %v240_v8 = vld [vmem:[%s756_s1 + $0x38] sm:$0xff]  ;;  %s207_s26 = scalar_lea.vmem %s755_s0, %s487_s21  ;;  %s223_s7 = scalar_lea.vmem %s758_s3, %s487_s21 }
   0xf   : > { %519 = vmatprep.subr.mxu0 %v247_v1  ;;  %562 = vmatprep.subr.mxu1 %v247_v1  ;;  %v239_v9 = vld [vmem:[%s756_s1 + $0x30] sm:$0xff]  ;;  %v238_v10 = vld [vmem:[%s756_s1 + $0x28] sm:$0xff]  ;;  %v237_v11 = vld [vmem:[%s756_s1 + $0x20] sm:$0xff] }
  0x10   : > { %520 = vmatpush3.msra.mxu0 %v247_v1  ;;  %578 = vmatpush3.msra.mxu1 %v247_v1  ;;  %v236_v12 = vld [vmem:[%s756_s1 + $0x18] sm:$0xff]  ;;  %v235_v13 = vld [vmem:[%s756_s1 + $0x10] sm:$0xff]  ;;  %v234_v14 = vld [vmem:[%s756_s1 + $0x8] sm:$0xff] }
  0x11   : > { %521 = vmatprep.subr.mxu0 %v246_v2  ;;  %563 = vmatprep.subr.mxu1 %v246_v2  ;;  %v233_v15 = vld [vmem:[%s756_s1] sm:$0xff]  ;;  %v226_v18 = vld [vmem:[%s207_s26 + $0x8] sm:$0xff]  ;;  %v227_v20 = vld [vmem:[%s207_s26 + $0x10] sm:$0xff] }
  0x12   : > { %522 = vmatpush3.msra.mxu0 %v246_v2  ;;  %579 = vmatpush3.msra.mxu1 %v246_v2  ;;  %v225_v16 = vld [vmem:[%s207_s26] sm:$0xff]  ;;  %v230_v19 = vld [vmem:[%s207_s26 + $0x28] sm:$0xff]  ;;  %v231_v21 = vld [vmem:[%s207_s26 + $0x30] sm:$0xff] }
  0x13   : > { %523 = vmatprep.subr.mxu0 %v245_v3  ;;  %564 = vmatprep.subr.mxu1 %v245_v3  ;;  %v229_v17 = vld [vmem:[%s207_s26 + $0x20] sm:$0xff]  ;;  %v228_v22 = vld [vmem:[%s207_s26 + $0x18] sm:$0xff] }
  0x14   : > { %524 = vmatpush3.msra.mxu0 %v245_v3  ;;  %580 = vmatpush3.msra.mxu1 %v245_v3  ;;  %v232_v23 = vld [vmem:[%s207_s26 + $0x38] sm:$0xff]  ;;  %v490_v24 = vld [vmem:[%s757_s2] ss:$0 sm:$0xff] }
  0x15   : > { %525 = vmatprep.subr.mxu0 %v244_v4  ;;  %565 = vmatprep.subr.mxu1 %v244_v4 }
  0x16   : > { %526 = vmatpush3.msra.mxu0 %v244_v4  ;;  %581 = vmatpush3.msra.mxu1 %v244_v4 }
  0x17   : > { %527 = vmatprep.subr.mxu0 %v243_v5  ;;  %566 = vmatprep.subr.mxu1 %v243_v5 }
  0x18   : > { %528 = vmatpush3.msra.mxu0 %v243_v5  ;;  %582 = vmatpush3.msra.mxu1 %v243_v5 }
  0x19   : > { %529 = vmatprep.subr.mxu0 %v242_v6  ;;  %567 = vmatprep.subr.mxu1 %v242_v6 }
  0x1a   : > { %530 = vmatpush3.msra.mxu0 %v242_v6  ;;  %583 = vmatpush3.msra.mxu1 %v242_v6 }
  0x1b   : > { %531 = vmatprep.subr.mxu0 %v241_v7  ;;  %568 = vmatprep.subr.mxu1 %v241_v7 }
  0x1c   : > { %532 = vmatpush3.msra.mxu0 %v241_v7  ;;  %584 = vmatpush3.msra.mxu1 %v241_v7 }
  0x1d   : > { %533 = vmatprep.subr.mxu0 %v240_v8  ;;  %569 = vmatprep.subr.mxu1 %v240_v8 }
  0x1e   : > { %534 = vmatpush3.msra.mxu0 %v240_v8  ;;  %585 = vmatpush3.msra.mxu1 %v240_v8 }
  0x1f   : > { %535 = vmatprep.subr.mxu0 %v239_v9  ;;  %570 = vmatprep.subr.mxu1 %v239_v9 }
  0x20   : > { %536 = vmatpush3.msra.mxu0 %v239_v9  ;;  %586 = vmatpush3.msra.mxu1 %v239_v9 }
  0x21   : > { %537 = vmatprep.subr.mxu0 %v238_v10  ;;  %571 = vmatprep.subr.mxu1 %v238_v10 }
  0x22   : > { %538 = vmatpush3.msra.mxu0 %v238_v10  ;;  %587 = vmatpush3.msra.mxu1 %v238_v10 }
  0x23   : > { %539 = vmatprep.subr.mxu0 %v237_v11  ;;  %572 = vmatprep.subr.mxu1 %v237_v11 }
  0x24   : > { %540 = vmatpush3.msra.mxu0 %v237_v11  ;;  %588 = vmatpush3.msra.mxu1 %v237_v11 }
  0x25   : > { %541 = vmatprep.subr.mxu0 %v236_v12  ;;  %573 = vmatprep.subr.mxu1 %v236_v12 }
  0x26   : > { %542 = vmatpush3.msra.mxu0 %v236_v12  ;;  %589 = vmatpush3.msra.mxu1 %v236_v12 }
  0x27   : > { %543 = vmatprep.subr.mxu0 %v235_v13  ;;  %574 = vmatprep.subr.mxu1 %v235_v13 }
  0x28   : > { %544 = vmatpush3.msra.mxu0 %v235_v13  ;;  %590 = vmatpush3.msra.mxu1 %v235_v13 }
  0x29   : > { %545 = vmatprep.subr.mxu0 %v234_v14  ;;  %575 = vmatprep.subr.mxu1 %v234_v14 }
  0x2a   : > { %546 = vmatpush3.msra.mxu0 %v234_v14  ;;  %591 = vmatpush3.msra.mxu1 %v234_v14 }
  0x2b   : > { %547 = vmatprep.subr.mxu0 %v233_v15  ;;  %576 = vmatprep.subr.mxu1 %v233_v15 }
  0x2c   : > { %548 = vmatpush3.msra.mxu0 %v233_v15  ;;  %592 = vmatpush3.msra.mxu1 %v233_v15 }
  0x2d   : > { %549 = vmatprep.mubr.f32.mxu0 %v225_v16  ;;  %555 = vmatprep.mubr.f32.mxu1 %v229_v17 }
  0x2e   : > { %550 = vmatmul.mubr.f32.vlgmr.msra.gmra.mxu0 %v226_v18  ;;  %556 = vmatmul.mubr.f32.vlgmr.msra.gmra.mxu1 %v230_v19 }
  0x2f   : > { %552 = vmatprep.mubr.f32.mxu0 %v227_v20  ;;  %558 = vmatprep.mubr.f32.mxu1 %v231_v21 }
  0x32   : > { %553 = vmatmul.mubr.f32.gmra.mxu0 %v228_v22  ;;  %559 = vmatmul.mubr.f32.gmra.mxu1 %v232_v23 }
  0xee   : > { %v551_v25 = vpop.f32.mrf.mxu0  ;;  %v557_v26 = vpop.f32.mrf.mxu1 }
  0xef   : > { %v328_v27 = vadd.f32 %v551_v25, %v490_v24  ;;  %v348_v28 = vadd.f32 %v557_v26, %v490_v24 }
  0xf0   : > { %v322_v29 = vpop.f32.mrf.mxu0  ;;  %v342_v30 = vpop.f32.mrf.mxu1 }
  0xf1   : > { %v362_v31 = vmax.f32 %v328_v27, 0.0  ;;  %v366_v32 = vmax.f32 %v348_v28, 0.0  ;;  %v323_v33 = vadd.f32 %v490_v24, %v322_v29  ;;  %v343_v34 = vadd.f32 %v490_v24, %v342_v30 }
  0xf2   : > { %v554_v35 = vpop.f32.mrf.mxu0  ;;  %v560_v36 = vpop.f32.mrf.mxu1 }
  0xf3   : > { %370 = vst [vmem:[%s223_s7 + $0x8] sm:$0xff] %v362_v31  ;;  %374 = vst [vmem:[%s223_s7 + $0x28] sm:$0xff] %v366_v32  ;;  %v361_v37 = vmax.f32 %v323_v33, 0.0  ;;  %v365_v38 = vmax.f32 %v343_v34, 0.0  ;;  %v338_v39 = vadd.f32 %v554_v35, %v490_v24  ;;  %v358_v40 = vadd.f32 %v560_v36, %v490_v24 }
  0xf4   : > { %v332_v41 = vpop.f32.mrf.mxu0  ;;  %v352_v42 = vpop.f32.mrf.mxu1 }
  0xf5   : > { %369 = vst [vmem:[%s223_s7] sm:$0xff] %v361_v37  ;;  %373 = vst [vmem:[%s223_s7 + $0x20] sm:$0xff] %v365_v38  ;;  %v364_v43 = vmax.f32 %v338_v39, 0.0  ;;  %v368_v44 = vmax.f32 %v358_v40, 0.0  ;;  %v333_v45 = vadd.f32 %v490_v24, %v332_v41  ;;  %v353_v46 = vadd.f32 %v490_v24, %v352_v42 }
  0xf7   : > { %372 = vst [vmem:[%s223_s7 + $0x18] sm:$0xff] %v364_v43  ;;  %376 = vst [vmem:[%s223_s7 + $0x38] sm:$0xff] %v368_v44  ;;  %v363_v47 = vmax.f32 %v333_v45, 0.0  ;;  %v367_v48 = vmax.f32 %v353_v46, 0.0 }
  0xf9   : > { %371 = vst [vmem:[%s223_s7 + $0x10] sm:$0xff] %v363_v47  ;;  %375 = vst [vmem:[%s223_s7 + $0x30] sm:$0xff] %v367_v48 }
  0xfa PF: > { %s13_s14 = sadd.s32 1, %s639_s14   ;;  %s759_s12 = smov %s635_s13 }
  0xfb   : > { %p10_p5 = scmp.ge.s32.totalorder %s13_s14, 4   ;;  %s760_s13 = smov %s762_s15 }
  0xfd   :  { %12 = sbr.rel (!%p10_p5) target bundleno = 2 (0x2), region = 68 }

// kernel: a_call__.3
= control target key start
LH: loop header
LB: loop body
LE: loop exit
PB: predicated region body
PF: predicated region fallthrough
CT: control target
= control target key end

     0   :  { %s1034_s21 = smov 0   ;;  %s1036_s22 = smov 0   ;;  %s1210_s0 = inlined_call_operand.vmem [shape: f32[128,128], index: 0, kind: input, shape index: {}]   ;;  %s1211_s1 = inlined_call_operand.vmem [shape: f32[128,128], index: 1, kind: input, shape index: {}]   ;;  %s1212_s2 = inlined_call_operand.vmem [shape: f32[1,128], index: 2, kind: input, shape index: {}]   ;;  %s1213_s3 = inlined_call_operand.vmem [shape: f32[128,128], index: 3, kind: input, shape index: {}]   ;;  %s1214_s4 = inlined_call_operand.vmem [shape: f32[128,128], index: 4, kind: input, shape index: {}]   ;;  %s1215_s5 = inlined_call_operand.vmem [shape: f32[1,128], index: 5, kind: input, shape index: {}]   ;;  %s1216_s6 = inlined_call_operand.vmem [shape: f32[128,128], index: 6, kind: output, shape index: {}]  }
   0x1   :  { %s1038_s23 = smov 0  }
   0x2 LB: > { %s28_s24 = sadd.s32 1, %s993_s22  ;;  %p804_p0 = scmp.ge.s32.totalorder %s997_s23, 1  ;;  %s997_s23 = sphi %s1038_s23, %s16_s23   ;;  %s993_s22 = sphi %s1036_s22, %s1218_s22   ;;  %s989_s21 = sphi %s1034_s21, %s1217_s21  }
   0x3   : > { %p30_p1 = scmp.ge.s32.totalorder %s28_s24, 2  ;;  %p272_p2 = scmp.lt.s32.totalorder %s997_s23, 3 }
   0x5   : > { %s1220_s24 = smov (%p30_p1, %s28_s24), 0  ;;  %p273_p3 = pnand %p804_p0, %p272_p2 }
   0x6   : > { %s805_s13 = sshll.u32 (!%p273_p3), %s989_s21, 3 }
   0x7   : > { %276 = sbr.rel (%p273_p3) target bundleno = 260 (0x104), region = 44  ;;  %p325_p4 = scmp.lt.s32.totalorder (!%p273_p3), %s805_s13, 15 }
   0xc   : > { %v382_v0 = vld [vmem:[%s1211_s1 + $0x78] sm:$0xff]  ;;  %v381_v2 = vld [vmem:[%s1211_s1 + $0x70] sm:$0xff]  ;;  %v380_v4 = vld [vmem:[%s1211_s1 + $0x68] sm:$0xff]  ;;  %s1222_s13 = smov (!%p325_p4, %s805_s13), 15 }
   0xd   : > { %v518_v1 = vld [vmem:[%s1214_s4 + $0x78] sm:$0xff]  ;;  %863 = vmatprep.subr.mxu0 %v382_v0  ;;  %v517_v3 = vld [vmem:[%s1214_s4 + $0x70] sm:$0xff]  ;;  %v516_v5 = vld [vmem:[%s1214_s4 + $0x68] sm:$0xff]  ;;  %s1133_s14 = sshll.u32 %s1222_s13, 3 }
   0xe   : > { %907 = vmatprep.subr.mxu1 %v518_v1  ;;  %864 = vmatpush3.msra.mxu0 %v382_v0  ;;  %v379_v6 = vld [vmem:[%s1211_s1 + $0x60] sm:$0xff]  ;;  %v378_v8 = vld [vmem:[%s1211_s1 + $0x58] sm:$0xff]  ;;  %v377_v10 = vld [vmem:[%s1211_s1 + $0x50] sm:$0xff]  ;;  %s1151_s27 = scalar_lea.vmem %s1210_s0, %s1133_s14  ;;  %s1157_s30 = scalar_lea.vmem %s1213_s3, %s1133_s14 }
   0xf   : > { %908 = vmatpush3.msra.mxu1 %v518_v1  ;;  %865 = vmatprep.subr.mxu0 %v381_v2  ;;  %v515_v7 = vld [vmem:[%s1214_s4 + $0x60] sm:$0xff]  ;;  %v514_v9 = vld [vmem:[%s1214_s4 + $0x58] sm:$0xff]  ;;  %v513_v11 = vld [vmem:[%s1214_s4 + $0x50] sm:$0xff]  ;;  %s1191_s19 = scalar_lea.vmem %s1216_s6, %s1133_s14 }
  0x10   : > { %909 = vmatprep.subr.mxu1 %v517_v3  ;;  %866 = vmatpush3.msra.mxu0 %v381_v2  ;;  %v376_v12 = vld [vmem:[%s1211_s1 + $0x48] sm:$0xff]  ;;  %v375_v14 = vld [vmem:[%s1211_s1 + $0x40] sm:$0xff]  ;;  %v374_v16 = vld [vmem:[%s1211_s1 + $0x38] sm:$0xff] }
  0x11   : > { %910 = vmatpush3.msra.mxu1 %v517_v3  ;;  %867 = vmatprep.subr.mxu0 %v380_v4  ;;  %v512_v13 = vld [vmem:[%s1214_s4 + $0x48] sm:$0xff]  ;;  %v511_v15 = vld [vmem:[%s1214_s4 + $0x40] sm:$0xff]  ;;  %v510_v17 = vld [vmem:[%s1214_s4 + $0x38] sm:$0xff] }
  0x12   : > { %911 = vmatprep.subr.mxu1 %v516_v5  ;;  %868 = vmatpush3.msra.mxu0 %v380_v4  ;;  %v373_v18 = vld [vmem:[%s1211_s1 + $0x30] sm:$0xff]  ;;  %v372_v20 = vld [vmem:[%s1211_s1 + $0x28] sm:$0xff]  ;;  %v371_v22 = vld [vmem:[%s1211_s1 + $0x20] sm:$0xff] }
  0x13   : > { %912 = vmatpush3.msra.mxu1 %v516_v5  ;;  %869 = vmatprep.subr.mxu0 %v379_v6  ;;  %v509_v19 = vld [vmem:[%s1214_s4 + $0x30] sm:$0xff]  ;;  %v508_v21 = vld [vmem:[%s1214_s4 + $0x28] sm:$0xff]  ;;  %v507_v23 = vld [vmem:[%s1214_s4 + $0x20] sm:$0xff] }
  0x14   : > { %913 = vmatprep.subr.mxu1 %v515_v7  ;;  %870 = vmatpush3.msra.mxu0 %v379_v6  ;;  %v370_v24 = vld [vmem:[%s1211_s1 + $0x18] sm:$0xff]  ;;  %v369_v26 = vld [vmem:[%s1211_s1 + $0x10] sm:$0xff]  ;;  %v368_v28 = vld [vmem:[%s1211_s1 + $0x8] sm:$0xff] }
  0x15   : > { %914 = vmatpush3.msra.mxu1 %v515_v7  ;;  %871 = vmatprep.subr.mxu0 %v378_v8  ;;  %v506_v25 = vld [vmem:[%s1214_s4 + $0x18] sm:$0xff]  ;;  %v505_v27 = vld [vmem:[%s1214_s4 + $0x10] sm:$0xff]  ;;  %v504_v29 = vld [vmem:[%s1214_s4 + $0x8] sm:$0xff] }
  0x16   : > { %915 = vmatprep.subr.mxu1 %v514_v9  ;;  %872 = vmatpush3.msra.mxu0 %v378_v8  ;;  %v367_v30 = vld [vmem:[%s1211_s1] sm:$0xff]  ;;  %v360_v34 = vld [vmem:[%s1151_s27 + $0x8] sm:$0xff]  ;;  %v361_v36 = vld [vmem:[%s1151_s27 + $0x10] sm:$0xff] }
  0x17   : > { %916 = vmatpush3.msra.mxu1 %v514_v9  ;;  %873 = vmatprep.subr.mxu0 %v377_v10  ;;  %v503_v31 = vld [vmem:[%s1214_s4] sm:$0xff]  ;;  %v496_v35 = vld [vmem:[%s1157_s30 + $0x8] sm:$0xff]  ;;  %v497_v37 = vld [vmem:[%s1157_s30 + $0x10] sm:$0xff] }
  0x18   : > { %917 = vmatprep.subr.mxu1 %v513_v11  ;;  %874 = vmatpush3.msra.mxu0 %v377_v10  ;;  %v359_v32 = vld [vmem:[%s1151_s27] sm:$0xff]  ;;  %v362_v38 = vld [vmem:[%s1151_s27 + $0x18] sm:$0xff]  ;;  %v364_v42 = vld [vmem:[%s1151_s27 + $0x28] sm:$0xff] }
  0x19   : > { %918 = vmatpush3.msra.mxu1 %v513_v11  ;;  %875 = vmatprep.subr.mxu0 %v376_v12  ;;  %v495_v33 = vld [vmem:[%s1157_s30] sm:$0xff]  ;;  %v498_v39 = vld [vmem:[%s1157_s30 + $0x18] sm:$0xff]  ;;  %v500_v43 = vld [vmem:[%s1157_s30 + $0x28] sm:$0xff] }
  0x1a   : > { %919 = vmatprep.subr.mxu1 %v512_v13  ;;  %876 = vmatpush3.msra.mxu0 %v376_v12  ;;  %v363_v40 = vld [vmem:[%s1151_s27 + $0x20] sm:$0xff]  ;;  %v365_v44 = vld [vmem:[%s1151_s27 + $0x30] sm:$0xff]  ;;  %v366_v46 = vld [vmem:[%s1151_s27 + $0x38] sm:$0xff] }
  0x1b   : > { %920 = vmatpush3.msra.mxu1 %v512_v13  ;;  %877 = vmatprep.subr.mxu0 %v375_v14  ;;  %v499_v41 = vld [vmem:[%s1157_s30 + $0x20] sm:$0xff]  ;;  %v501_v45 = vld [vmem:[%s1157_s30 + $0x30] sm:$0xff]  ;;  %v502_v47 = vld [vmem:[%s1157_s30 + $0x38] sm:$0xff] }
  0x1c   : > { %921 = vmatprep.subr.mxu1 %v511_v15  ;;  %878 = vmatpush3.msra.mxu0 %v375_v14  ;;  %v811_v48 = vld [vmem:[%s1212_s2] ss:$0 sm:$0xff] }
  0x1d   : > { %922 = vmatpush3.msra.mxu1 %v511_v15  ;;  %879 = vmatprep.subr.mxu0 %v374_v16  ;;  %v812_v49 = vld [vmem:[%s1215_s5] ss:$0 sm:$0xff] }
  0x1e   : > { %923 = vmatprep.subr.mxu1 %v510_v17  ;;  %880 = vmatpush3.msra.mxu0 %v374_v16 }
  0x1f   : > { %924 = vmatpush3.msra.mxu1 %v510_v17  ;;  %881 = vmatprep.subr.mxu0 %v373_v18 }
  0x20   : > { %925 = vmatprep.subr.mxu1 %v509_v19  ;;  %882 = vmatpush3.msra.mxu0 %v373_v18 }
  0x21   : > { %926 = vmatpush3.msra.mxu1 %v509_v19  ;;  %883 = vmatprep.subr.mxu0 %v372_v20 }
  0x22   : > { %927 = vmatprep.subr.mxu1 %v508_v21  ;;  %884 = vmatpush3.msra.mxu0 %v372_v20 }
  0x23   : > { %928 = vmatpush3.msra.mxu1 %v508_v21  ;;  %885 = vmatprep.subr.mxu0 %v371_v22 }
  0x24   : > { %929 = vmatprep.subr.mxu1 %v507_v23  ;;  %886 = vmatpush3.msra.mxu0 %v371_v22 }
  0x25   : > { %930 = vmatpush3.msra.mxu1 %v507_v23  ;;  %887 = vmatprep.subr.mxu0 %v370_v24 }
  0x26   : > { %931 = vmatprep.subr.mxu1 %v506_v25  ;;  %888 = vmatpush3.msra.mxu0 %v370_v24 }
  0x27   : > { %932 = vmatpush3.msra.mxu1 %v506_v25  ;;  %889 = vmatprep.subr.mxu0 %v369_v26 }
  0x28   : > { %933 = vmatprep.subr.mxu1 %v505_v27  ;;  %890 = vmatpush3.msra.mxu0 %v369_v26 }
  0x29   : > { %934 = vmatpush3.msra.mxu1 %v505_v27  ;;  %891 = vmatprep.subr.mxu0 %v368_v28 }
  0x2a   : > { %935 = vmatprep.subr.mxu1 %v504_v29  ;;  %892 = vmatpush3.msra.mxu0 %v368_v28 }
  0x2b   : > { %936 = vmatpush3.msra.mxu1 %v504_v29  ;;  %893 = vmatprep.subr.mxu0 %v367_v30 }
  0x2c   : > { %937 = vmatprep.subr.mxu1 %v503_v31  ;;  %894 = vmatpush3.msra.mxu0 %v367_v30 }
  0x2d   : > { %895 = vmatprep.mubr.f32.mxu0 %v359_v32  ;;  %938 = vmatpush3.msra.mxu1 %v503_v31 }
  0x2e   : > { %939 = vmatprep.mubr.f32.mxu1 %v495_v33  ;;  %896 = vmatmul.mubr.f32.vlgmr.msra.gmra.mxu0 %v360_v34 }
  0x2f   : > { %940 = vmatmul.mubr.f32.vlgmr.msra.gmra.mxu1 %v496_v35  ;;  %898 = vmatprep.mubr.f32.mxu0 %v361_v36 }
  0x30   : > { %942 = vmatprep.mubr.f32.mxu1 %v497_v37 }
  0x32   : > { %899 = vmatmul.mubr.f32.gmra.mxu0 %v362_v38 }
  0x33   : > { %943 = vmatmul.mubr.f32.gmra.mxu1 %v498_v39  ;;  %901 = vmatprep.mubr.f32.mxu0 %v363_v40 }
  0x34   : > { %945 = vmatprep.mubr.f32.mxu1 %v499_v41 }
  0x36   : > { %902 = vmatmul.mubr.f32.gmra.mxu0 %v364_v42 }
  0x37   : > { %946 = vmatmul.mubr.f32.gmra.mxu1 %v500_v43  ;;  %904 = vmatprep.mubr.f32.mxu0 %v365_v44 }
  0x38   : > { %948 = vmatprep.mubr.f32.mxu1 %v501_v45 }
  0x3a   : > { %905 = vmatmul.mubr.f32.gmra.mxu0 %v366_v46 }
  0x3b   : > { %949 = vmatmul.mubr.f32.gmra.mxu1 %v502_v47 }
  0xee   : > { %v897_v50 = vpop.f32.mrf.mxu0 }
  0xef   : > { %v941_v51 = vpop.f32.mrf.mxu1  ;;  %v462_v52 = vadd.f32 %v897_v50, %v811_v48 }
  0xf0   : > { %v598_v53 = vadd.f32 %v941_v51, %v812_v49  ;;  %v456_v54 = vpop.f32.mrf.mxu0 }
  0xf1   : > { %v592_v55 = vpop.f32.mrf.mxu1  ;;  %v632_v56 = vmul.f32 0.5, %v462_v52  ;;  %v457_v57 = vadd.f32 %v811_v48, %v456_v54 }
  0xf2   : > { %v593_v58 = vadd.f32 %v812_v49, %v592_v55  ;;  %v900_v59 = vpop.f32.mrf.mxu0 }
  0xf3   : > { %v944_v60 = vpop.f32.mrf.mxu1  ;;  %v640_v61 = vadd.f32 %v632_v56, %v598_v53  ;;  %v631_v62 = vmul.f32 0.5, %v457_v57  ;;  %v472_v63 = vadd.f32 %v900_v59, %v811_v48 }
  0xf4   : > { %v608_v0 = vadd.f32 %v944_v60, %v812_v49  ;;  %v466_v1 = vpop.f32.mrf.mxu0 }
  0xf5   : > { %v602_v2 = vpop.f32.mrf.mxu1  ;;  %648 = vst [vmem:[%s1191_s19 + $0x8] sm:$0xff] %v640_v61  ;;  %v639_v3 = vadd.f32 %v631_v62, %v593_v58  ;;  %v634_v4 = vmul.f32 0.5, %v472_v63  ;;  %v467_v5 = vadd.f32 %v811_v48, %v466_v1 }
  0xf6   : > { %v603_v6 = vadd.f32 %v812_v49, %v602_v2  ;;  %v903_v7 = vpop.f32.mrf.mxu0 }
  0xf7   : > { %v947_v8 = vpop.f32.mrf.mxu1  ;;  %647 = vst [vmem:[%s1191_s19] sm:$0xff] %v639_v3  ;;  %v642_v9 = vadd.f32 %v634_v4, %v608_v0  ;;  %v633_v10 = vmul.f32 0.5, %v467_v5  ;;  %v482_v11 = vadd.f32 %v903_v7, %v811_v48 }
  0xf8   : > { %v618_v12 = vadd.f32 %v947_v8, %v812_v49  ;;  %v476_v13 = vpop.f32.mrf.mxu0 }
  0xf9   : > { %v612_v14 = vpop.f32.mrf.mxu1  ;;  %650 = vst [vmem:[%s1191_s19 + $0x18] sm:$0xff] %v642_v9  ;;  %v641_v15 = vadd.f32 %v633_v10, %v603_v6  ;;  %v636_v16 = vmul.f32 0.5, %v482_v11  ;;  %v477_v17 = vadd.f32 %v811_v48, %v476_v13 }
  0xfa   : > { %v613_v18 = vadd.f32 %v812_v49, %v612_v14  ;;  %v906_v19 = vpop.f32.mrf.mxu0 }
  0xfb   : > { %v950_v20 = vpop.f32.mrf.mxu1  ;;  %649 = vst [vmem:[%s1191_s19 + $0x10] sm:$0xff] %v641_v15  ;;  %v644_v21 = vadd.f32 %v636_v16, %v618_v12  ;;  %v635_v22 = vmul.f32 0.5, %v477_v17  ;;  %v492_v23 = vadd.f32 %v906_v19, %v811_v48 }
  0xfc   : > { %v628_v24 = vadd.f32 %v950_v20, %v812_v49  ;;  %v486_v25 = vpop.f32.mrf.mxu0 }
  0xfd   : > { %v622_v26 = vpop.f32.mrf.mxu1  ;;  %652 = vst [vmem:[%s1191_s19 + $0x28] sm:$0xff] %v644_v21  ;;  %v643_v27 = vadd.f32 %v635_v22, %v613_v18  ;;  %v638_v28 = vmul.f32 0.5, %v492_v23  ;;  %v487_v29 = vadd.f32 %v811_v48, %v486_v25 }
  0xfe   : > { %v623_v32 = vadd.f32 %v812_v49, %v622_v26 }
  0xff   : > { %651 = vst [vmem:[%s1191_s19 + $0x20] sm:$0xff] %v643_v27  ;;  %v646_v30 = vadd.f32 %v638_v28, %v628_v24  ;;  %v637_v31 = vmul.f32 0.5, %v487_v29 }
 0x101   : > { %654 = vst [vmem:[%s1191_s19 + $0x38] sm:$0xff] %v646_v30  ;;  %v645_v33 = vadd.f32 %v637_v31, %v623_v32 }
 0x103   : > { %653 = vst [vmem:[%s1191_s19 + $0x30] sm:$0xff] %v645_v33 }
 0x104 PF: > { %s16_s23 = sadd.s32 1, %s997_s23   ;;  %s1217_s21 = smov %s993_s22 }
 0x105   : > { %p13_p5 = scmp.ge.s32.totalorder %s16_s23, 4   ;;  %s1218_s22 = smov %s1220_s24 }
 0x107   :  { %15 = sbr.rel (!%p13_p5) target bundleno = 2 (0x2), region = 89 }

</bundles_post_ra>
